<compile_context>
chip_gen: v6e
topology: v6e:2x2x1
jax: 0.10.0
libtpu: 0.0.40
codegen_flags: <defaults>
</compile_context>

<pallas_src>
import math
import numpy as np
import jax
import jax.numpy as jnp
from jax.experimental import pallas as pl
from jax.experimental.pallas import tpu as pltpu

# ----------------------------- configuration --------------------------------
B = 2                      # batch (B != 1 -> Block returns a plain tensor)
DIM = 32                   # embedding dim C
NUM_HEADS = 4
HEAD_DIM = DIM // NUM_HEADS
L = 4                      # spatial side; N = L*L tokens
N_TOK = L * L
BN = B * N_TOK             # rows of the single fused tile
MLP_RATIO = 4.0
HIDDEN = int(DIM * MLP_RATIO)
EPS = 1e-5                 # nn.LayerNorm default eps
INV_SQRT2 = np.float32(1.0 / math.sqrt(2.0))

# The uniform-attention fold below maps each N-element chunk of the flattened v
# onto one column-half of a token row; that needs C == 2*N (true for this config).
assert DIM == 2 * N_TOK


# --------------------------------- kernel ------------------------------------
def _block_kernel(x_ref, g1_ref, b1_ref, wvh0_ref, wvh1_ref, q0_ref, q1_ref,
                  bavg_ref, bproj_ref, g2_ref, b2_ref, w1t_ref, bf1_ref,
                  w2t_ref, bf2_ref, o_ref):
    """Fused Block forward on one (B*N, C) tile (single grid step, all in VMEM)."""
    x = x_ref[...]                                            # (BN, C)

    # ---- LayerNorm 1 ----
    mu = jnp.mean(x, axis=-1, keepdims=True)
    xc = x - mu
    var = jnp.mean(xc * xc, axis=-1, keepdims=True)
    xn1 = xc / jnp.sqrt(var + EPS) * g1_ref[...] + b1_ref[...]

    # ---- LMSA, uniform-softmax folded form ----
    # softmax of a row-constant logit is exactly 1/N, so attn @ v is the per-batch
    # mean of N-element chunks of the flattened v = xn1 @ Wv^T.  Chunk sums are
    # the per-token column-half sums of v (folded into wvh0/wvh1, columns
    # replicated so the lane broadcast is done by the MXU for free); the
    # view/permute scramble + proj weight are folded into q0/q1; the per-batch
    # mean + broadcast back to every token is the bavg matmul.
    hs0 = jnp.dot(xn1, wvh0_ref[...], preferred_element_type=jnp.float32)   # (BN, C), cols identical
    hs1 = jnp.dot(xn1, wvh1_ref[...], preferred_element_type=jnp.float32)
    contrib = hs0 * q0_ref[...] + hs1 * q1_ref[...]                         # (BN, C)
    delta = jnp.dot(bavg_ref[...], contrib, preferred_element_type=jnp.float32)
    x1 = x + delta + bproj_ref[...]                                         # attention residual

    # ---- LayerNorm 2 ----
    mu2 = jnp.mean(x1, axis=-1, keepdims=True)
    xc2 = x1 - mu2
    var2 = jnp.mean(xc2 * xc2, axis=-1, keepdims=True)
    xn2 = xc2 / jnp.sqrt(var2 + EPS) * g2_ref[...] + b2_ref[...]

    # ---- MLP (exact erf GELU), residual ----
    h1 = jnp.dot(xn2, w1t_ref[...], preferred_element_type=jnp.float32) + bf1_ref[...]
    h1 = 0.5 * h1 * (1.0 + jax.lax.erf(h1 * INV_SQRT2))
    y = jnp.dot(h1, w2t_ref[...], preferred_element_type=jnp.float32) + bf2_ref[...]
    o_ref[...] = x1 + y


# ------------------------------- wrapper --------------------------------------
def _full_spec(shape):
    nd = len(shape)
    return pl.BlockSpec(shape, lambda i, nd=nd: (0,) * nd)


def block_forward(x, p):
    """Pallas implementation of Block.forward for B != 1 (all dropouts are p=0)."""
    # -------- parameter-only preprocessing (input independent glue) --------
    # wvh[:, s] = column-half sums of Wv^T  (== chunk sums of the flattened v).
    wvh = p['wv_t'].reshape(DIM, DIM // N_TOK, N_TOK).sum(axis=-1)        # (C, 2)
    wvh0w = jnp.tile(wvh[:, 0:1], (1, DIM))                               # (C, C) replicated cols
    wvh1w = jnp.tile(wvh[:, 1:2], (1, DIM))
    # q{0,1}[i, :] = proj-weight row feeding output channel 2*(i%N)+s
    # (this encodes PyTorch's `.view(B,H,hd,N).permute(0,1,3,2)` scramble).
    cpn = DIM // N_TOK                                                    # chunks per token row (=2)
    r = jnp.arange(BN) % N_TOK
    q0 = p['wproj_t'][cpn * r + 0, :]                                     # (BN, C)
    q1 = p['wproj_t'][cpn * r + 1, :]
    # Per-batch mean of `contrib`, broadcast back to every token of that batch.
    b_idx = jnp.arange(BN) // N_TOK
    bavg = (b_idx[:, None] == b_idx[None, :]).astype(jnp.float32) / N_TOK  # (BN, BN)

    x_flat = x.reshape(BN, DIM)                                           # free row-major reshape
    out_flat = pl.pallas_call(
        _block_kernel,
        grid=(1,),
        in_specs=[
            _full_spec((BN, DIM)),       # x
            _full_spec((1, DIM)),        # g1
            _full_spec((1, DIM)),        # b1
            _full_spec((DIM, DIM)),      # wvh0w
            _full_spec((DIM, DIM)),      # wvh1w
            _full_spec((BN, DIM)),       # q0
            _full_spec((BN, DIM)),       # q1
            _full_spec((BN, BN)),        # bavg
            _full_spec((1, DIM)),        # bproj
            _full_spec((1, DIM)),        # g2
            _full_spec((1, DIM)),        # b2
            _full_spec((DIM, HIDDEN)),   # wfc1_t
            _full_spec((1, HIDDEN)),     # bfc1
            _full_spec((HIDDEN, DIM)),   # wfc2_t
            _full_spec((1, DIM)),        # bfc2
        ],
        out_specs=_full_spec((BN, DIM)),
        out_shape=jax.ShapeDtypeStruct((BN, DIM), jnp.float32),
        compiler_params=pltpu.CompilerParams(dimension_semantics=("arbitrary",)),
    )(x_flat, p['g1'], p['b1'], wvh0w, wvh1w, q0, q1, bavg, p['bproj'],
      p['g2'], p['b2'], p['wfc1_t'], p['bfc1'], p['wfc2_t'], p['bfc2'])
    return out_flat.reshape(B, N_TOK, DIM)


# ------------------------- deterministic parameters ---------------------------
def init_params(key):
    ks = jax.random.split(key, 16)

    def nrm(k, shape, scale):
        return (scale * jax.random.normal(k, shape)).astype(jnp.float32)

    p = {}
    p['att_token'] = nrm(ks[0], (NUM_HEADS, DIM, 3, 3), 0.02)   # trunc_normal(std=0.02)-like
    p['wq1'] = nrm(ks[1], (DIM, DIM), 1.0 / math.sqrt(DIM))     # linear_att_q (1x1 conv, O x I)
    p['bq1'] = nrm(ks[2], (DIM,), 0.02)
    p['wk1'] = nrm(ks[3], (DIM, DIM), 1.0 / math.sqrt(DIM))     # linear_att_k
    p['bk1'] = nrm(ks[4], (DIM,), 0.02)
    p['wv_t'] = nrm(ks[5], (DIM, DIM), 1.0 / math.sqrt(DIM))    # v (qkv_bias=False), pre-transposed
    p['wproj_t'] = nrm(ks[6], (DIM, DIM), 1.0 / math.sqrt(DIM))
    p['bproj'] = nrm(ks[7], (1, DIM), 0.02)
    p['g1'] = (1.0 + 0.1 * jax.random.normal(ks[8], (1, DIM))).astype(jnp.float32)
    p['b1'] = nrm(ks[9], (1, DIM), 0.02)
    p['g2'] = (1.0 + 0.1 * jax.random.normal(ks[10], (1, DIM))).astype(jnp.float32)
    p['b2'] = nrm(ks[11], (1, DIM), 0.02)
    p['wfc1_t'] = nrm(ks[12], (DIM, HIDDEN), 1.0 / math.sqrt(DIM))
    p['bfc1'] = nrm(ks[13], (1, HIDDEN), 0.02)
    p['wfc2_t'] = nrm(ks[14], (HIDDEN, DIM), 1.0 / math.sqrt(HIDDEN))
    p['bfc2'] = nrm(ks[15], (1, DIM), 0.02)
    return p


# ---------------------- pure-JAX reference (full faithful path) ----------------
def reference_block(x, p):
    def ln(t, g, b):
        mu = t.mean(-1, keepdims=True)
        var = ((t - mu) ** 2).mean(-1, keepdims=True)
        return (t - mu) / jnp.sqrt(var + EPS) * g + b

    xn1 = ln(x, p['g1'], p['b1'])
    kq_full = (jnp.einsum('oc,hcij->hoij', p['wq1'], p['att_token'])
               + p['bq1'][None, :, None, None])
    kk_full = (jnp.einsum('oc,hcij->hoij', p['wk1'], p['att_token'])
               + p['bk1'][None, :, None, None])
    x_img = jnp.transpose(xn1, (0, 2, 1)).reshape(B, DIM, L, L)
    dn = ('NCHW', 'OIHW', 'NCHW')
    cq = jax.lax.conv_general_dilated(x_img, kq_full, (1, 1), ((1, 1), (1, 1)),
                                      dimension_numbers=dn)
    ck = jax.lax.conv_general_dilated(x_img, kk_full, (1, 1), ((1, 1), (1, 1)),
                                      dimension_numbers=dn)
    a = jax.nn.sigmoid(cq * ck).reshape(B, NUM_HEADS, N_TOK)
    attn = jax.nn.softmax(
        jnp.broadcast_to(a[..., None], (B, NUM_HEADS, N_TOK, N_TOK)), axis=-1)
    v_lin = xn1 @ p['wv_t']
    v_att = v_lin.reshape(B, NUM_HEADS, HEAD_DIM, N_TOK).transpose(0, 1, 3, 2)
    ctx = jnp.einsum('bhij,bhjd->bhid', attn, v_att)
    ctx = ctx.transpose(0, 2, 1, 3).reshape(B, N_TOK, DIM)
    x1 = x + ctx @ p['wproj_t'] + p['bproj']
    xn2 = ln(x1, p['g2'], p['b2'])
    h1 = xn2 @ p['wfc1_t'] + p['bfc1']
    h1 = 0.5 * h1 * (1.0 + jax.lax.erf(h1 * INV_SQRT2))
    return x1 + h1 @ p['wfc2_t'] + p['bfc2']


# ---------------------------------- main --------------------------------------
if __name__ == "__main__":
    key = jax.random.PRNGKey(0)
    kx, kp = jax.random.split(key)
    x = jax.random.normal(kx, (B, N_TOK, DIM), jnp.float32)
    params = init_params(kp)

    out = jax.block_until_ready(block_forward(x, params))
    ref = jax.block_until_ready(reference_block(x, params))

    assert out.shape == (B, N_TOK, DIM)
    np.testing.assert_allclose(np.asarray(out), np.asarray(ref), rtol=2e-2, atol=2e-2)
    print("KERNEL_OK")
</pallas_src>

<mosaic_0001>
module attributes {stable_mosaic.version = 11 : i64} {
  func.func @_block_kernel(%arg0: i32, %arg1: memref<32x32xf32, #tpu.memory_space<vmem>>, %arg2: memref<1x32xf32, #tpu.memory_space<vmem>>, %arg3: memref<1x32xf32, #tpu.memory_space<vmem>>, %arg4: memref<32x32xf32, #tpu.memory_space<vmem>>, %arg5: memref<32x32xf32, #tpu.memory_space<vmem>>, %arg6: memref<32x32xf32, #tpu.memory_space<vmem>>, %arg7: memref<32x32xf32, #tpu.memory_space<vmem>>, %arg8: memref<32x32xf32, #tpu.memory_space<vmem>>, %arg9: memref<1x32xf32, #tpu.memory_space<vmem>>, %arg10: memref<1x32xf32, #tpu.memory_space<vmem>>, %arg11: memref<1x32xf32, #tpu.memory_space<vmem>>, %arg12: memref<32x128xf32, #tpu.memory_space<vmem>>, %arg13: memref<1x128xf32, #tpu.memory_space<vmem>>, %arg14: memref<128x32xf32, #tpu.memory_space<vmem>>, %arg15: memref<1x32xf32, #tpu.memory_space<vmem>>, %arg16: memref<32x32xf32, #tpu.memory_space<vmem>>) attributes {dimension_semantics = [#tpu.dimension_semantics<arbitrary>], iteration_bounds = array<i64: 1>, scalar_prefetch = 0 : i64, scratch_operands = 0 : i64, tpu.core_type = #tpu.core_type<tc>, window_params = [{pipeline_mode = #tpu.pipeline_mode<synchronous>, transform_indices = @transform_0, window_bounds = array<i64: 32, 32>}, {pipeline_mode = #tpu.pipeline_mode<synchronous>, transform_indices = @transform_1, window_bounds = array<i64: 1, 32>}, {pipeline_mode = #tpu.pipeline_mode<synchronous>, transform_indices = @transform_2, window_bounds = array<i64: 1, 32>}, {pipeline_mode = #tpu.pipeline_mode<synchronous>, transform_indices = @transform_3, window_bounds = array<i64: 32, 32>}, {pipeline_mode = #tpu.pipeline_mode<synchronous>, transform_indices = @transform_4, window_bounds = array<i64: 32, 32>}, {pipeline_mode = #tpu.pipeline_mode<synchronous>, transform_indices = @transform_5, window_bounds = array<i64: 32, 32>}, {pipeline_mode = #tpu.pipeline_mode<synchronous>, transform_indices = @transform_6, window_bounds = array<i64: 32, 32>}, {pipeline_mode = #tpu.pipeline_mode<synchronous>, transform_indices = @transform_7, window_bounds = array<i64: 32, 32>}, {pipeline_mode = #tpu.pipeline_mode<synchronous>, transform_indices = @transform_8, window_bounds = array<i64: 1, 32>}, {pipeline_mode = #tpu.pipeline_mode<synchronous>, transform_indices = @transform_9, window_bounds = array<i64: 1, 32>}, {pipeline_mode = #tpu.pipeline_mode<synchronous>, transform_indices = @transform_10, window_bounds = array<i64: 1, 32>}, {pipeline_mode = #tpu.pipeline_mode<synchronous>, transform_indices = @transform_11, window_bounds = array<i64: 32, 128>}, {pipeline_mode = #tpu.pipeline_mode<synchronous>, transform_indices = @transform_12, window_bounds = array<i64: 1, 128>}, {pipeline_mode = #tpu.pipeline_mode<synchronous>, transform_indices = @transform_13, window_bounds = array<i64: 128, 32>}, {pipeline_mode = #tpu.pipeline_mode<synchronous>, transform_indices = @transform_14, window_bounds = array<i64: 1, 32>}, {pipeline_mode = #tpu.pipeline_mode<synchronous>, transform_indices = @transform_15, window_bounds = array<i64: 32, 32>}]} {
    %c0 = arith.constant 0 : index
    %c0_0 = arith.constant 0 : index
    %0 = vector.load %arg1[%c0, %c0_0] : memref<32x32xf32, #tpu.memory_space<vmem>>, vector<32x32xf32>
    %cst = arith.constant dense<0.000000e+00> : vector<32xf32>
    %1 = vector.multi_reduction <add>, %0, %cst [1] : vector<32x32xf32> to vector<32xf32>
    %2 = vector.shape_cast %1 : vector<32xf32> to vector<32x1xf32>
    %cst_1 = arith.constant 3.200000e+01 : f32
    %3 = vector.broadcast %cst_1 : f32 to vector<32x1xf32>
    %4 = arith.divf %2, %3 : vector<32x1xf32>
    %5 = vector.broadcast %4 : vector<32x1xf32> to vector<32x32xf32>
    %6 = arith.subf %0, %5 : vector<32x32xf32>
    %7 = arith.mulf %6, %6 : vector<32x32xf32>
    %cst_2 = arith.constant dense<0.000000e+00> : vector<32xf32>
    %8 = vector.multi_reduction <add>, %7, %cst_2 [1] : vector<32x32xf32> to vector<32xf32>
    %9 = vector.shape_cast %8 : vector<32xf32> to vector<32x1xf32>
    %cst_3 = arith.constant 3.200000e+01 : f32
    %10 = vector.broadcast %cst_3 : f32 to vector<32x1xf32>
    %11 = arith.divf %9, %10 : vector<32x1xf32>
    %cst_4 = arith.constant 9.99999974E-6 : f32
    %12 = vector.broadcast %cst_4 : f32 to vector<32x1xf32>
    %13 = arith.addf %11, %12 : vector<32x1xf32>
    %14 = math.sqrt %13 : vector<32x1xf32>
    %15 = vector.broadcast %14 : vector<32x1xf32> to vector<32x32xf32>
    %16 = arith.divf %6, %15 : vector<32x32xf32>
    %c0_5 = arith.constant 0 : index
    %c0_6 = arith.constant 0 : index
    %17 = vector.load %arg2[%c0_5, %c0_6] : memref<1x32xf32, #tpu.memory_space<vmem>>, vector<1x32xf32>
    %18 = vector.broadcast %17 : vector<1x32xf32> to vector<32x32xf32>
    %19 = arith.mulf %16, %18 : vector<32x32xf32>
    %c0_7 = arith.constant 0 : index
    %c0_8 = arith.constant 0 : index
    %20 = vector.load %arg3[%c0_7, %c0_8] : memref<1x32xf32, #tpu.memory_space<vmem>>, vector<1x32xf32>
    %21 = vector.broadcast %20 : vector<1x32xf32> to vector<32x32xf32>
    %22 = arith.addf %19, %21 : vector<32x32xf32>
    %c0_9 = arith.constant 0 : index
    %c0_10 = arith.constant 0 : index
    %23 = vector.load %arg4[%c0_9, %c0_10] : memref<32x32xf32, #tpu.memory_space<vmem>>, vector<32x32xf32>
    %cst_11 = arith.constant dense<0.000000e+00> : vector<32x32xf32>
    %24 = tpu.matmul %22, %23, %cst_11 {dimension_numbers = #tpu.dot_dimension_numbers<[1], [0], [0], [1], [0, 0, 1, 1], [], []>} : vector<32x32xf32>, vector<32x32xf32>, vector<32x32xf32> -> vector<32x32xf32>
    %c0_12 = arith.constant 0 : index
    %c0_13 = arith.constant 0 : index
    %25 = vector.load %arg5[%c0_12, %c0_13] : memref<32x32xf32, #tpu.memory_space<vmem>>, vector<32x32xf32>
    %cst_14 = arith.constant dense<0.000000e+00> : vector<32x32xf32>
    %26 = tpu.matmul %22, %25, %cst_14 {dimension_numbers = #tpu.dot_dimension_numbers<[1], [0], [0], [1], [0, 0, 1, 1], [], []>} : vector<32x32xf32>, vector<32x32xf32>, vector<32x32xf32> -> vector<32x32xf32>
    %c0_15 = arith.constant 0 : index
    %c0_16 = arith.constant 0 : index
    %27 = vector.load %arg6[%c0_15, %c0_16] : memref<32x32xf32, #tpu.memory_space<vmem>>, vector<32x32xf32>
    %28 = arith.mulf %24, %27 : vector<32x32xf32>
    %c0_17 = arith.constant 0 : index
    %c0_18 = arith.constant 0 : index
    %29 = vector.load %arg7[%c0_17, %c0_18] : memref<32x32xf32, #tpu.memory_space<vmem>>, vector<32x32xf32>
    %30 = arith.mulf %26, %29 : vector<32x32xf32>
    %31 = arith.addf %28, %30 : vector<32x32xf32>
    %c0_19 = arith.constant 0 : index
    %c0_20 = arith.constant 0 : index
    %32 = vector.load %arg8[%c0_19, %c0_20] : memref<32x32xf32, #tpu.memory_space<vmem>>, vector<32x32xf32>
    %cst_21 = arith.constant dense<0.000000e+00> : vector<32x32xf32>
    %33 = tpu.matmul %32, %31, %cst_21 {dimension_numbers = #tpu.dot_dimension_numbers<[1], [0], [0], [1], [0, 0, 1, 1], [], []>} : vector<32x32xf32>, vector<32x32xf32>, vector<32x32xf32> -> vector<32x32xf32>
    %34 = arith.addf %0, %33 : vector<32x32xf32>
    %c0_22 = arith.constant 0 : index
    %c0_23 = arith.constant 0 : index
    %35 = vector.load %arg9[%c0_22, %c0_23] : memref<1x32xf32, #tpu.memory_space<vmem>>, vector<1x32xf32>
    %36 = vector.broadcast %35 : vector<1x32xf32> to vector<32x32xf32>
    %37 = arith.addf %34, %36 : vector<32x32xf32>
    %cst_24 = arith.constant dense<0.000000e+00> : vector<32xf32>
    %38 = vector.multi_reduction <add>, %37, %cst_24 [1] : vector<32x32xf32> to vector<32xf32>
    %39 = vector.shape_cast %38 : vector<32xf32> to vector<32x1xf32>
    %cst_25 = arith.constant 3.200000e+01 : f32
    %40 = vector.broadcast %cst_25 : f32 to vector<32x1xf32>
    %41 = arith.divf %39, %40 : vector<32x1xf32>
    %42 = vector.broadcast %41 : vector<32x1xf32> to vector<32x32xf32>
    %43 = arith.subf %37, %42 : vector<32x32xf32>
    %44 = arith.mulf %43, %43 : vector<32x32xf32>
    %cst_26 = arith.constant dense<0.000000e+00> : vector<32xf32>
    %45 = vector.multi_reduction <add>, %44, %cst_26 [1] : vector<32x32xf32> to vector<32xf32>
    %46 = vector.shape_cast %45 : vector<32xf32> to vector<32x1xf32>
    %cst_27 = arith.constant 3.200000e+01 : f32
    %47 = vector.broadcast %cst_27 : f32 to vector<32x1xf32>
    %48 = arith.divf %46, %47 : vector<32x1xf32>
    %cst_28 = arith.constant 9.99999974E-6 : f32
    %49 = vector.broadcast %cst_28 : f32 to vector<32x1xf32>
    %50 = arith.addf %48, %49 : vector<32x1xf32>
    %51 = math.sqrt %50 : vector<32x1xf32>
    %52 = vector.broadcast %51 : vector<32x1xf32> to vector<32x32xf32>
    %53 = arith.divf %43, %52 : vector<32x32xf32>
    %c0_29 = arith.constant 0 : index
    %c0_30 = arith.constant 0 : index
    %54 = vector.load %arg10[%c0_29, %c0_30] : memref<1x32xf32, #tpu.memory_space<vmem>>, vector<1x32xf32>
    %55 = vector.broadcast %54 : vector<1x32xf32> to vector<32x32xf32>
    %56 = arith.mulf %53, %55 : vector<32x32xf32>
    %c0_31 = arith.constant 0 : index
    %c0_32 = arith.constant 0 : index
    %57 = vector.load %arg11[%c0_31, %c0_32] : memref<1x32xf32, #tpu.memory_space<vmem>>, vector<1x32xf32>
    %58 = vector.broadcast %57 : vector<1x32xf32> to vector<32x32xf32>
    %59 = arith.addf %56, %58 : vector<32x32xf32>
    %c0_33 = arith.constant 0 : index
    %c0_34 = arith.constant 0 : index
    %60 = vector.load %arg12[%c0_33, %c0_34] : memref<32x128xf32, #tpu.memory_space<vmem>>, vector<32x128xf32>
    %cst_35 = arith.constant dense<0.000000e+00> : vector<32x128xf32>
    %61 = tpu.matmul %59, %60, %cst_35 {dimension_numbers = #tpu.dot_dimension_numbers<[1], [0], [0], [1], [0, 0, 1, 1], [], []>} : vector<32x32xf32>, vector<32x128xf32>, vector<32x128xf32> -> vector<32x128xf32>
    %c0_36 = arith.constant 0 : index
    %c0_37 = arith.constant 0 : index
    %62 = vector.load %arg13[%c0_36, %c0_37] : memref<1x128xf32, #tpu.memory_space<vmem>>, vector<1x128xf32>
    %63 = vector.broadcast %62 : vector<1x128xf32> to vector<32x128xf32>
    %64 = arith.addf %61, %63 : vector<32x128xf32>
    %cst_38 = arith.constant 5.000000e-01 : f32
    %65 = vector.broadcast %cst_38 : f32 to vector<32x128xf32>
    %66 = arith.mulf %65, %64 : vector<32x128xf32>
    %cst_39 = arith.constant 0.707106769 : f32
    %67 = vector.broadcast %cst_39 : f32 to vector<32x128xf32>
    %68 = arith.mulf %64, %67 : vector<32x128xf32>
    %69 = math.erf %68 : vector<32x128xf32>
    %cst_40 = arith.constant 1.000000e+00 : f32
    %70 = vector.broadcast %cst_40 : f32 to vector<32x128xf32>
    %71 = arith.addf %70, %69 : vector<32x128xf32>
    %72 = arith.mulf %66, %71 : vector<32x128xf32>
    %c0_41 = arith.constant 0 : index
    %c0_42 = arith.constant 0 : index
    %73 = vector.load %arg14[%c0_41, %c0_42] : memref<128x32xf32, #tpu.memory_space<vmem>>, vector<128x32xf32>
    %cst_43 = arith.constant dense<0.000000e+00> : vector<32x32xf32>
    %74 = tpu.matmul %72, %73, %cst_43 {dimension_numbers = #tpu.dot_dimension_numbers<[1], [0], [0], [1], [0, 0, 1, 1], [], []>} : vector<32x128xf32>, vector<128x32xf32>, vector<32x32xf32> -> vector<32x32xf32>
    %c0_44 = arith.constant 0 : index
    %c0_45 = arith.constant 0 : index
    %75 = vector.load %arg15[%c0_44, %c0_45] : memref<1x32xf32, #tpu.memory_space<vmem>>, vector<1x32xf32>
    %76 = vector.broadcast %75 : vector<1x32xf32> to vector<32x32xf32>
    %77 = arith.addf %74, %76 : vector<32x32xf32>
    %78 = arith.addf %37, %77 : vector<32x32xf32>
    %c0_46 = arith.constant 0 : index
    %c0_47 = arith.constant 0 : index
    %79 = vector.load %arg16[%c0_46, %c0_47] : memref<32x32xf32, #tpu.memory_space<vmem>>, vector<32x32xf32>
    tpu.vector_store %arg16[%c0_46, %c0_47], %78 {strides = array<i32>} : memref<32x32xf32, #tpu.memory_space<vmem>>, vector<32x32xf32>,
    return
  }
  func.func @transform_0(%arg0: i32) -> (i32, i32) {
    %c0_i32 = arith.constant 0 : i32
    %c0_i32_0 = arith.constant 0 : i32
    %c0_i32_1 = arith.constant 0 : i32
    return %c0_i32, %c0_i32_0 : i32, i32
  }
  func.func @transform_1(%arg0: i32) -> (i32, i32) {
    %c0_i32 = arith.constant 0 : i32
    %c0_i32_0 = arith.constant 0 : i32
    %c0_i32_1 = arith.constant 0 : i32
    return %c0_i32, %c0_i32_0 : i32, i32
  }
  func.func @transform_2(%arg0: i32) -> (i32, i32) {
    %c0_i32 = arith.constant 0 : i32
    %c0_i32_0 = arith.constant 0 : i32
    %c0_i32_1 = arith.constant 0 : i32
    return %c0_i32, %c0_i32_0 : i32, i32
  }
  func.func @transform_3(%arg0: i32) -> (i32, i32) {
    %c0_i32 = arith.constant 0 : i32
    %c0_i32_0 = arith.constant 0 : i32
    %c0_i32_1 = arith.constant 0 : i32
    return %c0_i32, %c0_i32_0 : i32, i32
  }
  func.func @transform_4(%arg0: i32) -> (i32, i32) {
    %c0_i32 = arith.constant 0 : i32
    %c0_i32_0 = arith.constant 0 : i32
    %c0_i32_1 = arith.constant 0 : i32
    return %c0_i32, %c0_i32_0 : i32, i32
  }
  func.func @transform_5(%arg0: i32) -> (i32, i32) {
    %c0_i32 = arith.constant 0 : i32
    %c0_i32_0 = arith.constant 0 : i32
    %c0_i32_1 = arith.constant 0 : i32
    return %c0_i32, %c0_i32_0 : i32, i32
  }
  func.func @transform_6(%arg0: i32) -> (i32, i32) {
    %c0_i32 = arith.constant 0 : i32
    %c0_i32_0 = arith.constant 0 : i32
    %c0_i32_1 = arith.constant 0 : i32
    return %c0_i32, %c0_i32_0 : i32, i32
  }
  func.func @transform_7(%arg0: i32) -> (i32, i32) {
    %c0_i32 = arith.constant 0 : i32
    %c0_i32_0 = arith.constant 0 : i32
    %c0_i32_1 = arith.constant 0 : i32
    return %c0_i32, %c0_i32_0 : i32, i32
  }
  func.func @transform_8(%arg0: i32) -> (i32, i32) {
    %c0_i32 = arith.constant 0 : i32
    %c0_i32_0 = arith.constant 0 : i32
    %c0_i32_1 = arith.constant 0 : i32
    return %c0_i32, %c0_i32_0 : i32, i32
  }
  func.func @transform_9(%arg0: i32) -> (i32, i32) {
    %c0_i32 = arith.constant 0 : i32
    %c0_i32_0 = arith.constant 0 : i32
    %c0_i32_1 = arith.constant 0 : i32
    return %c0_i32, %c0_i32_0 : i32, i32
  }
  func.func @transform_10(%arg0: i32) -> (i32, i32) {
    %c0_i32 = arith.constant 0 : i32
    %c0_i32_0 = arith.constant 0 : i32
    %c0_i32_1 = arith.constant 0 : i32
    return %c0_i32, %c0_i32_0 : i32, i32
  }
  func.func @transform_11(%arg0: i32) -> (i32, i32) {
    %c0_i32 = arith.constant 0 : i32
    %c0_i32_0 = arith.constant 0 : i32
    %c0_i32_1 = arith.constant 0 : i32
    return %c0_i32, %c0_i32_0 : i32, i32
  }
  func.func @transform_12(%arg0: i32) -> (i32, i32) {
    %c0_i32 = arith.constant 0 : i32
    %c0_i32_0 = arith.constant 0 : i32
    %c0_i32_1 = arith.constant 0 : i32
    return %c0_i32, %c0_i32_0 : i32, i32
  }
  func.func @transform_13(%arg0: i32) -> (i32, i32) {
    %c0_i32 = arith.constant 0 : i32
    %c0_i32_0 = arith.constant 0 : i32
    %c0_i32_1 = arith.constant 0 : i32
    return %c0_i32, %c0_i32_0 : i32, i32
  }
  func.func @transform_14(%arg0: i32) -> (i32, i32) {
    %c0_i32 = arith.constant 0 : i32
    %c0_i32_0 = arith.constant 0 : i32
    %c0_i32_1 = arith.constant 0 : i32
    return %c0_i32, %c0_i32_0 : i32, i32
  }
  func.func @transform_15(%arg0: i32) -> (i32, i32) {
    %c0_i32 = arith.constant 0 : i32
    %c0_i32_0 = arith.constant 0 : i32
    %c0_i32_1 = arith.constant 0 : i32
    return %c0_i32, %c0_i32_0 : i32, i32
  }
}

</mosaic_0001>

<bundles_post_ra>
// kernel: tpu_custom_call.1
= control target key start
LH: loop header
LB: loop body
LE: loop exit
PB: predicated region body
PF: predicated region fallthrough
CT: control target
= control target key end

     0   :  { %20 = vsyncpa [#allocation3], 0  ;;  %s1509_s0 = inlined_call_operand.vmem [shape: f32[32,32], index: 0, kind: input, shape index: {}]   ;;  %s1510_s1 = inlined_call_operand.vmem [shape: f32[1,32], index: 1, kind: input, shape index: {}]   ;;  %s1511_s2 = inlined_call_operand.vmem [shape: f32[1,32], index: 2, kind: input, shape index: {}]   ;;  %s1512_s3 = inlined_call_operand.vmem [shape: f32[32,32], index: 3, kind: input, shape index: {}]   ;;  %s1513_s4 = inlined_call_operand.vmem [shape: f32[32,32], index: 4, kind: input, shape index: {}]   ;;  %s1514_s5 = inlined_call_operand.vmem [shape: f32[32,32], index: 5, kind: input, shape index: {}]   ;;  %s1515_s6 = inlined_call_operand.vmem [shape: f32[32,32], index: 6, kind: input, shape index: {}]   ;;  %s1516_s7 = inlined_call_operand.hbm [shape: f32[32,32], index: 7, kind: input, shape index: {}]   ;;  %s1517_s8 = inlined_call_operand.vmem [shape: f32[1,32], index: 8, kind: input, shape index: {}]   ;;  %s1518_s9 = inlined_call_operand.vmem [shape: f32[1,32], index: 9, kind: input, shape index: {}]   ;;  %s1519_s10 = inlined_call_operand.vmem [shape: f32[1,32], index: 10, kind: input, shape index: {}]   ;;  %s1520_s11 = inlined_call_operand.hbm [shape: f32[32,128], index: 11, kind: input, shape index: {}]   ;;  %s1521_s12 = inlined_call_operand.vmem [shape: f32[1,128], index: 12, kind: input, shape index: {}]   ;;  %s1522_s13 = inlined_call_operand.vmem [shape: f32[128,32], index: 13, kind: input, shape index: {}]   ;;  %s1523_s14 = inlined_call_operand.vmem [shape: f32[1,32], index: 14, kind: input, shape index: {}]   ;;  %s1524_s15 = inlined_call_operand.hbm [shape: f32[32,32], index: 15, kind: output, shape index: {}]  }
   0x1   :  { %21 = vsyncpa [#allocation6], 0 }
   0x2   :  { %22 = vsyncpa [#allocation4], 0  ;;  %s1157_s18 = smov [#allocation2]  }
   0x3   :  { %s42_s19 = sshll.u32 %s1157_s18, 4  ;;  %s43_s19 = int_to_ptr.vmem [resolvable:$true] %s42_s19 }
   0x4   :  { %s1099_s20 = scalar_lea.vmem %s43_s19, 512  ;;  %p1104_p1 = scmp.lt.s32.totalorder %s43_s19, %s43_s19 }
   0x5   :  { %p1100_p0 = scmp.ne.s32.totalorder %s43_s19, %s1099_s20  ;;  %p1105_p2 = scmp.lt.s32.totalorder %s1099_s20, %s1099_s20 }
   0x7   :  { %p1106_p3 = por %p1105_p2, %p1104_p1 }
   0x9   :  { %p1107_p4 = pnand %p1106_p3, %p1100_p0 }
   0xb   :  { %1110 = shalt.err (!%p1107_p4)
}
   0xc   :  { %s1158_s21 = smov 128   ;;  %s1159_s22 = smov 8  }
   0xd   :  { %48 = dma.hbm_to_vmem [thread:$0]  %s1516_s7, 512, %s43_s19, [#allocation3], %s1158_s21, %s1158_s21, %s1159_s22  }
   0xe   :  { %s1160_s25 = smov [#allocation5]  }
   0xf   :  { %s60_s26 = sshll.u32 %s1160_s25, 4  ;;  %s61_s26 = int_to_ptr.vmem [resolvable:$true] %s60_s26 }
  0x10   :  { %s1119_s27 = scalar_lea.vmem %s61_s26, 512  ;;  %p1124_p6 = scmp.lt.s32.totalorder %s61_s26, %s61_s26 }
  0x11   :  { %p1120_p5 = scmp.ne.s32.totalorder %s61_s26, %s1119_s27  ;;  %p1125_p7 = scmp.lt.s32.totalorder %s1119_s27, %s1119_s27 }
  0x13   :  { %p1126_p8 = por %p1125_p7, %p1124_p6 }
  0x15   :  { %p1127_p9 = pnand %p1126_p8, %p1120_p5 }
  0x17   :  { %1130 = shalt.err (!%p1127_p9)
}
  0x18   :  { %66 = dma.hbm_to_vmem [thread:$0]  %s1520_s11, 512, %s61_s26, [#allocation6], %s1158_s21, %s1158_s21, %s1159_s22  }
  0x19   :  { %1151 = dma.done.wait [#allocation3], 512  }
  0x1a   :  { %1152 = vsyncadd [#allocation3], 4294966784 }
  0x1b   :  { %1153 = dma.done.wait [#allocation6], 512  }
  0x1c   :  { %1154 = vsyncadd [#allocation6], 4294966784  ;;  %vm83_vm0 = vcmask 261120   ;;  %v1257_v0 = vld [vmem:[%s1509_s0] sm:$0xff]  ;;  %v1262_v1 = vld [vmem:[%s1509_s0 + $0x10] sm:$0xff]  ;;  %s1161_s28 = smov [#allocation7]  }
  0x1d   :  { %v1267_v2 = vld [vmem:[%s1509_s0 + $0x8] sm:$0xff]  ;;  %v84_v3 = vsel %vm83_vm0, %v1257_v0, 0.0  ;;  %v90_v4 = vsel %vm83_vm0, %v1262_v1, 0.0  ;;  %v1276_v5 = vld [vmem:[%s1509_s0 + $0x18] sm:$0xff]  ;;  %v189_v29 = vld [vmem:[%s1512_s3 + $0x10] sm:$0xff]  ;;  %s864_s29 = sshll.u32 %s1161_s28, 4  ;;  %s865_s29 = int_to_ptr.vmem [resolvable:$true] %s864_s29 }
  0x1e   :  { %85 = vadd.xlane.f32.xlu0 %v84_v3  ;;  %91 = vadd.xlane.f32.xlu1 %v90_v4  ;;  %v87_v6 = vsel %vm83_vm0, %v1267_v2, 0.0  ;;  %v93_v7 = vsel %vm83_vm0, %v1276_v5, 0.0  ;;  %v190_v28 = vld [vmem:[%s1512_s3 + $0x18] sm:$0xff]  ;;  %v188_v30 = vld [vmem:[%s1512_s3 + $0x8] sm:$0xff]  ;;  %v187_v31 = vld [vmem:[%s1512_s3] sm:$0xff]  ;;  %p1136_p11 = scmp.lt.s32.totalorder %s865_s29, %s865_s29 }
  0x1f   :  { %952 = vmatprep.subr.mxu1 %v190_v28  ;;  %v1321_v32 = vld [vmem:[%s1513_s4 + $0x18] sm:$0xff] }
  0x20   :  { %953 = vmatpush3.msra.mxu1 %v190_v28 }
  0x21   :  { %954 = vmatprep.subr.mxu1 %v189_v29 }
  0x22   :  { %88 = vadd.xlane.f32.xlu0 %v87_v6  ;;  %94 = vadd.xlane.f32.xlu1 %v93_v7  ;;  %v877_v6 = vld [vmem:[%s1510_s1] ss:$0 sm:$0xff] }
  0x23   :  { %955 = vmatpush3.msra.mxu1 %v189_v29 }
  0x24   :  { %956 = vmatprep.subr.mxu1 %v188_v30 }
  0x25   :  { %957 = vmatpush3.msra.mxu1 %v188_v30 }
  0x26   :  { %958 = vmatprep.subr.mxu1 %v187_v31 }
  0x27   :  { %959 = vmatpush3.msra.mxu1 %v187_v31 }
  0x28   :  { %966 = vmatprep.subr.mxu1 %v1321_v32 }
  0xa7   :  { %v86_v8 = vpop.xlane.xlu0 %85  ;;  %v92_v9 = vpop.xlane.xlu1 %91 }
  0xa8   :  { %v97_v10 = vmul.f32 0.03125, %v86_v8  ;;  %v99_v11 = vmul.f32 0.03125, %v92_v9  ;;  %v878_v8 = vld [vmem:[%s1511_s2] ss:$0 sm:$0xff] }
  0xaa   :  { %v1283_v12 = vsub.f32 %v1257_v0, %v97_v10  ;;  %v1286_v13 = vsub.f32 %v1262_v1, %v99_v11 }
  0xab   :  { %v89_v14 = vpop.xlane.xlu0 %88  ;;  %v95_v15 = vpop.xlane.xlu1 %94 }
  0xac   :  { %v98_v16 = vmul.f32 0.03125, %v89_v14  ;;  %v100_v17 = vmul.f32 0.03125, %v95_v15  ;;  %v105_v18 = vmul.f32 %v1283_v12, %v1283_v12  ;;  %v107_v19 = vmul.f32 %v1286_v13, %v1286_v13 }
  0xae   :  { %v1293_v20 = vsub.f32 %v1267_v2, %v98_v16  ;;  %v1296_v21 = vsub.f32 %v1276_v5, %v100_v17  ;;  %v109_v22 = vsel %vm83_vm0, %v105_v18, 0.0  ;;  %v115_v23 = vsel %vm83_vm0, %v107_v19, 0.0 }
  0xaf   :  { %110 = vadd.xlane.f32.xlu0 %v109_v22 }
  0xb0   :  { %v106_v24 = vmul.f32 %v1293_v20, %v1293_v20  ;;  %v108_v25 = vmul.f32 %v1296_v21, %v1296_v21 }
  0xb2   :  { %v112_v26 = vsel %vm83_vm0, %v106_v24, 0.0  ;;  %v118_v27 = vsel %vm83_vm0, %v108_v25, 0.0  ;;  %v290_v24 = vld [vmem:[%s1513_s4 + $0x10] sm:$0xff] }
  0xb3   :  { %116 = vadd.xlane.f32.xlu0 %v115_v23  ;;  %113 = vadd.xlane.f32.xlu1 %v112_v26  ;;  %v397_v26 = vld [vmem:[#allocation2] sm:$0xff] }
  0xb7   :  { %119 = vadd.xlane.f32.xlu1 %v118_v27 }
 0x138   :  { %v111_v33 = vpop.xlane.xlu0 %110 }
 0x139   :  { %v121_v34 = vmul.f32 0.03125, %v111_v33 }
 0x13b   :  { %v125_v35 = vadd.f32 1e-05, %v121_v34  ;;  %v388_v34 = vld [vmem:[%s1515_s6 + $0x18] sm:$0xff] }
 0x13c   :  { %v114_v36 = vpop.xlane.xlu1 %113  ;;  %v117_v37 = vpop.xlane.xlu0 %116 }
 0x13d   :  { %1051 = vrsqrt.f32 %v125_v35  ;;  %v122_v38 = vmul.f32 0.03125, %v114_v36  ;;  %v123_v39 = vmul.f32 0.03125, %v117_v37  ;;  %vm131_vm1 = vcmp.eq.f32.partialorder %v125_v35, inf  ;;  %v386_v36 = vld [vmem:[%s1515_s6 + $0x8] sm:$0xff] }
 0x13e   :  { %v134_v47 = vand.u32 2147483648, %v125_v35  ;;  %vm133_vm2 = vcmp.eq.f32.partialorder %v125_v35, 0.0 }
 0x13f   :  { %v126_v40 = vadd.f32 1e-05, %v122_v38  ;;  %v127_v41 = vadd.f32 1e-05, %v123_v39  ;;  %v387_v38 = vld [vmem:[%s1515_s6 + $0x10] sm:$0xff] }
 0x140   :  { %v120_v42 = vpop.xlane.xlu1 %119 }
 0x141   :  { %v124_v43 = vmul.f32 0.03125, %v120_v42  ;;  %1053 = vrsqrt.f32 %v126_v40  ;;  %vm138_vm3 = vcmp.eq.f32.partialorder %v126_v40, inf  ;;  %v141_v53 = vand.u32 2147483648, %v126_v40  ;;  %v385_v42 = vld [vmem:[%s1515_s6] sm:$0xff] }
 0x142   :  { %1055 = vrsqrt.f32 %v127_v41  ;;  %vm140_vm4 = vcmp.eq.f32.partialorder %v126_v40, 0.0  ;;  %vm145_vm5 = vcmp.eq.f32.partialorder %v127_v41, inf  ;;  %v148_v56 = vand.u32 2147483648, %v127_v41 }
 0x143   :  { %v128_v44 = vadd.f32 1e-05, %v124_v43  ;;  %vm147_vm6 = vcmp.eq.f32.partialorder %v127_v41, 0.0 }
 0x145   :  { %1057 = vrsqrt.f32 %v128_v44  ;;  %vm152_vm7 = vcmp.eq.f32.partialorder %v128_v44, inf  ;;  %v155_v62 = vand.u32 2147483648, %v128_v44  ;;  %vm154_vm8 = vcmp.eq.f32.partialorder %v128_v44, 0.0 }
 0x14a   :  { %v1052_v45 = vpop.eup %1051 }
 0x14b   :  { %v130_v46 = vmul.f32 %v1052_v45, %v125_v35 }
 0x14d   :  { %v132_v48 = vsel %vm131_vm1, %v125_v35, %v130_v46  ;;  %v379_v35 = vld [vmem:[%s1514_s5 + $0x10] sm:$0xff] }
 0x14e   :  { %v135_v49 = vsel %vm133_vm2, %v134_v47, %v132_v48  ;;  %v1054_v50 = vpop.eup %1053  ;;  %v377_v48 = vld [vmem:[%s1514_s5] sm:$0xff] }
 0x14f   :  { %1059 = vrcp.f32 %v135_v49  ;;  %v1056_v51 = vpop.eup %1055  ;;  %v137_v52 = vmul.f32 %v1054_v50, %v126_v40 }
 0x150   :  { %v144_v54 = vmul.f32 %v1056_v51, %v127_v41 }
 0x151   :  { %v139_v55 = vsel %vm138_vm3, %v126_v40, %v137_v52 }
 0x152   :  { %v1058_v57 = vpop.eup %1057  ;;  %v142_v58 = vsel %vm140_vm4, %v141_v53, %v139_v55  ;;  %v146_v59 = vsel %vm145_vm5, %v127_v41, %v144_v54  ;;  %v378_v41 = vld [vmem:[%s1514_s5 + $0x8] sm:$0xff] }
 0x153   :  { %1061 = vrcp.f32 %v142_v58  ;;  %v149_v60 = vsel %vm147_vm6, %v148_v56, %v146_v59  ;;  %v151_v61 = vmul.f32 %v1058_v57, %v128_v44  ;;  %v398_v55 = vld [vmem:[#allocation2 + $0x8] sm:$0xff]  ;;  %v399_v56 = vld [vmem:[#allocation2 + $0x10] sm:$0xff]  ;;  %v400_v57 = vld [vmem:[#allocation2 + $0x18] sm:$0xff] }
 0x154   :  { %1063 = vrcp.f32 %v149_v60  ;;  %v891_v59 = vld [vmem:[%s1517_s8] ss:$0 sm:$0xff] }
 0x155   :  { %v153_v63 = vsel %vm152_vm7, %v128_v44, %v151_v61 }
 0x156   :  { %v156_v3 = vsel %vm154_vm8, %v155_v62, %v153_v63 }
 0x157   :  { %1065 = vrcp.f32 %v156_v3 }
 0x15c   :  { %v1060_v4 = vpop.eup %1059 }
 0x15d   :  { %v158_v7 = vmul.f32 %v1060_v4, %v1283_v12 }
 0x15f   :  { %v172_v9 = vmul.f32 %v877_v6, %v158_v7 }
 0x160   :  { %v1062_v10 = vpop.eup %1061 }
 0x161   :  { %v183_v11 = vadd.f32 %v878_v8, %v172_v9  ;;  %v1064_v14 = vpop.eup %1063  ;;  %v160_v15 = vmul.f32 %v1062_v10, %v1293_v20 }
 0x162   :  { %v162_v16 = vmul.f32 %v1064_v14, %v1286_v13  ;;  %v289_v13 = vld [vmem:[%s1513_s4 + $0x8] sm:$0xff] }
 0x163   :  { %960 = vmatprep.mubr.msk.f32.mxu1 %vm83_vm0, %v183_v11  ;;  %v173_v17 = vmul.f32 %v877_v6, %v160_v15 }
 0x164   :  { %v1066_v18 = vpop.eup %1065  ;;  %v174_v19 = vmul.f32 %v877_v6, %v162_v16 }
 0x165   :  { %v184_v22 = vadd.f32 %v878_v8, %v173_v17  ;;  %v164_v12 = vmul.f32 %v1066_v18, %v1296_v21  ;;  %v288_v21 = vld [vmem:[%s1513_s4] sm:$0xff] }
 0x166   :  { %v185_v23 = vadd.f32 %v878_v8, %v174_v19 }
 0x167   :  { %961 = vmatmul.mubr.msk.f32.vlgmr.msra.gmra.mxu1 %vm83_vm0, %v184_v22  ;;  %v175_v25 = vmul.f32 %v877_v6, %v164_v12 }
 0x168   :  { %963 = vmatprep.mubr.msk.f32.mxu1 %vm83_vm0, %v185_v23  ;;  %967 = vmatpush3.msra.mxu1 %v1321_v32  ;;  %v380_v32 = vld [vmem:[%s1514_s5 + $0x18] sm:$0xff] }
 0x169   :  { %968 = vmatprep.subr.mxu1 %v290_v24  ;;  %v186_v20 = vadd.f32 %v878_v8, %v175_v25 }
 0x16a   :  { %969 = vmatpush3.msra.mxu1 %v290_v24 }
 0x16b   :  { %964 = vmatmul.mubr.msk.f32.gmra.mxu1 %vm83_vm0, %v186_v20  ;;  %970 = vmatprep.subr.mxu1 %v289_v13 }
 0x16c   :  { %971 = vmatpush3.msra.mxu1 %v289_v13  ;;  %974 = vmatprep.mubr.msk.f32.mxu1 %vm83_vm0, %v183_v11 }
 0x16d   :  { %972 = vmatprep.subr.mxu1 %v288_v21 }
 0x16e   :  { %973 = vmatpush3.msra.mxu1 %v288_v21 }
 0x16f   :  { %975 = vmatmul.mubr.msk.f32.vlgmr.msra.gmra.mxu1 %vm83_vm0, %v184_v22 }
 0x170   :  { %977 = vmatprep.mubr.msk.f32.mxu1 %vm83_vm0, %v185_v23 }
 0x173   :  { %978 = vmatmul.mubr.msk.f32.gmra.mxu1 %vm83_vm0, %v186_v20 }
 0x174   :  { %988 = vmatprep.mubr.msk.f32.mxu1 %vm83_vm0, %v397_v26 }
 0x227   :  { %v962_v27 = vpop.f32.mrf.mxu1 }
 0x228   :  { %v382_v49 = vmul.f32 %v962_v27, %v378_v41 }
 0x229   :  { %v269_v28 = vpop.f32.mrf.mxu1 }
 0x22a   :  { %v381_v52 = vmul.f32 %v377_v48, %v269_v28 }
 0x22b   :  { %v965_v29 = vpop.f32.mrf.mxu1 }
 0x22c   :  { %v384_v39 = vmul.f32 %v965_v29, %v380_v32  ;;  %v617_v32 = vld [vmem:[#allocation5 + $0x10] sm:$0xff] }
 0x22d   :  { %v279_v30 = vpop.f32.mrf.mxu1 }
 0x22e   :  { %v383_v44 = vmul.f32 %v379_v35, %v279_v30  ;;  %v758_v35 = vld [vmem:[%s1522_s13 + $0x78] sm:$0xff] }
 0x22f   :  { %v976_v31 = vpop.f32.mrf.mxu1  ;;  %1008 = vmatprep.subr.mxu0 %v758_v35 }
 0x230   :  { %v390_v45 = vmul.f32 %v976_v31, %v386_v36  ;;  %v618_v31 = vld [vmem:[#allocation5 + $0x18] sm:$0xff]  ;;  %v757_v36 = vld [vmem:[%s1522_s13 + $0x70] sm:$0xff]  ;;  %1009 = vmatpush3.msra.mxu0 %v758_v35  ;;  %v748_v35 = vld [vmem:[%s1522_s13 + $0x28] sm:$0xff] }
 0x231   :  { %v358_v33 = vpop.f32.mrf.mxu1  ;;  %1010 = vmatprep.subr.mxu0 %v757_v36 }
 0x232   :  { %v389_v50 = vmul.f32 %v385_v42, %v358_v33  ;;  %v394_v53 = vadd.f32 %v390_v45, %v382_v49  ;;  %v616_v33 = vld [vmem:[#allocation5 + $0x8] sm:$0xff]  ;;  %1011 = vmatpush3.msra.mxu0 %v757_v36  ;;  %v747_v36 = vld [vmem:[%s1522_s13 + $0x20] sm:$0xff] }
 0x233   :  { %v979_v37 = vpop.f32.mrf.mxu1 }
 0x234   :  { %v392_v40 = vmul.f32 %v979_v37, %v388_v34  ;;  %v393_v54 = vadd.f32 %v389_v50, %v381_v52  ;;  %v615_v34 = vld [vmem:[#allocation5] sm:$0xff]  ;;  %v756_v37 = vld [vmem:[%s1522_s13 + $0x68] sm:$0xff] }
 0x235   :  { %v368_v43 = vpop.f32.mrf.mxu1  ;;  %1012 = vmatprep.subr.mxu0 %v756_v37 }
 0x236   :  { %v396_v46 = vadd.f32 %v392_v40, %v384_v39  ;;  %v391_v47 = vmul.f32 %v387_v38, %v368_v43  ;;  %1013 = vmatpush3.msra.mxu0 %v756_v37  ;;  %v746_v37 = vld [vmem:[%s1522_s13 + $0x18] sm:$0xff] }
 0x238   :  { %v395_v51 = vadd.f32 %v391_v47, %v383_v44  ;;  %980 = vmatprep.subr.mxu1 %v396_v46 }
 0x239   :  { %981 = vmatpush3.msra.mxu1 %v396_v46 }
 0x23a   :  { %982 = vmatprep.subr.mxu1 %v395_v51 }
 0x23b   :  { %983 = vmatpush3.msra.mxu1 %v395_v51 }
 0x23c   :  { %984 = vmatprep.subr.mxu1 %v394_v53 }
 0x23d   :  { %985 = vmatpush3.msra.mxu1 %v394_v53 }
 0x23e   :  { %986 = vmatprep.subr.mxu1 %v393_v54 }
 0x23f   :  { %987 = vmatpush3.msra.mxu1 %v393_v54 }
 0x240   :  { %989 = vmatmul.mubr.msk.f32.vlgmr.msra.gmra.mxu1 %vm83_vm0, %v398_v55  ;;  %994 = vmatprep.subr.mxu1 %v618_v31 }
 0x241   :  { %991 = vmatprep.mubr.msk.f32.mxu1 %vm83_vm0, %v399_v56  ;;  %995 = vmatpush3.msra.mxu1 %v618_v31  ;;  %v752_v31 = vld [vmem:[%s1522_s13 + $0x48] sm:$0xff] }
 0x242   :  { %996 = vmatprep.subr.mxu1 %v617_v32 }
 0x243   :  { %997 = vmatpush3.msra.mxu1 %v617_v32  ;;  %v751_v32 = vld [vmem:[%s1522_s13 + $0x40] sm:$0xff] }
 0x244   :  { %992 = vmatmul.mubr.msk.f32.gmra.mxu1 %vm83_vm0, %v400_v57  ;;  %998 = vmatprep.subr.mxu1 %v616_v33 }
 0x245   :  { %999 = vmatpush3.msra.mxu1 %v616_v33  ;;  %v750_v33 = vld [vmem:[%s1522_s13 + $0x38] sm:$0xff] }
 0x246   :  { %1000 = vmatprep.subr.mxu1 %v615_v34 }
 0x247   :  { %1001 = vmatpush3.msra.mxu1 %v615_v34  ;;  %v749_v34 = vld [vmem:[%s1522_s13 + $0x30] sm:$0xff] }
 0x300   :  { %v990_v58 = vpop.f32.mrf.mxu1 }
 0x301   :  { %v499_v60 = vadd.f32 %v990_v58, %v1267_v2 }
 0x302   :  { %v479_v61 = vpop.f32.mrf.mxu1 }
 0x303   :  { %v1384_v62 = vadd.f32 %v891_v59, %v499_v60  ;;  %v498_v63 = vadd.f32 %v479_v61, %v1257_v0 }
 0x304   :  { %v993_v3 = vpop.f32.mrf.mxu1 }
 0x305   :  { %v1387_v4 = vadd.f32 %v891_v59, %v498_v63  ;;  %v501_v6 = vadd.f32 %v993_v3, %v1276_v5  ;;  %v516_v7 = vsel %vm83_vm0, %v1384_v62, 0.0 }
 0x306   :  { %517 = vadd.xlane.f32.xlu1 %v516_v7  ;;  %v489_v8 = vpop.f32.mrf.mxu1 }
 0x307   :  { %v1392_v9 = vadd.f32 %v891_v59, %v501_v6  ;;  %v500_v10 = vadd.f32 %v489_v8, %v1262_v1  ;;  %v513_v2 = vsel %vm83_vm0, %v1387_v4, 0.0 }
 0x308   :  { %514 = vadd.xlane.f32.xlu0 %v513_v2 }
 0x309   :  { %v1397_v11 = vadd.f32 %v891_v59, %v500_v10  ;;  %v522_v0 = vsel %vm83_vm0, %v1392_v9, 0.0 }
 0x30a   :  { %523 = vadd.xlane.f32.xlu1 %v522_v0 }
 0x30b   :  { %v519_v5 = vsel %vm83_vm0, %v1397_v11, 0.0 }
 0x30c   :  { %520 = vadd.xlane.f32.xlu0 %v519_v5 }
 0x38f   :  { %v518_v14 = vpop.xlane.xlu1 %517 }
 0x390   :  { %v526_v15 = vmul.f32 0.03125, %v518_v14 }
 0x391   :  { %v515_v16 = vpop.xlane.xlu0 %514 }
 0x392   :  { %v1404_v17 = vsub.f32 %v1384_v62, %v526_v15  ;;  %v525_v1 = vmul.f32 0.03125, %v515_v16  ;;  %v892_v15 = vld [vmem:[%s1518_s9] ss:$0 sm:$0xff] }
 0x393   :  { %v524_v18 = vpop.xlane.xlu1 %523 }
 0x394   :  { %v1407_v19 = vsub.f32 %v1387_v4, %v525_v1  ;;  %v528_v22 = vmul.f32 0.03125, %v524_v18  ;;  %v534_v12 = vmul.f32 %v1404_v17, %v1404_v17 }
 0x395   :  { %v521_v23 = vpop.xlane.xlu0 %520 }
 0x396   :  { %v1412_v24 = vsub.f32 %v1392_v9, %v528_v22  ;;  %v527_v25 = vmul.f32 0.03125, %v521_v23  ;;  %v540_v13 = vsel %vm83_vm0, %v534_v12, 0.0  ;;  %v533_v20 = vmul.f32 %v1407_v19, %v1407_v19  ;;  %v893_v23 = vld [vmem:[%s1519_s10] ss:$0 sm:$0xff] }
 0x397   :  { %541 = vadd.xlane.f32.xlu1 %v540_v13 }
 0x398   :  { %v1418_v21 = vsub.f32 %v1397_v11, %v527_v25  ;;  %v537_v26 = vsel %vm83_vm0, %v533_v20, 0.0  ;;  %v536_v27 = vmul.f32 %v1412_v24, %v1412_v24 }
 0x399   :  { %538 = vadd.xlane.f32.xlu0 %v537_v26 }
 0x39a   :  { %v546_v28 = vsel %vm83_vm0, %v536_v27, 0.0  ;;  %v535_v29 = vmul.f32 %v1418_v21, %v1418_v21 }
 0x39b   :  { %547 = vadd.xlane.f32.xlu1 %v546_v28 }
 0x39c   :  { %v543_v30 = vsel %vm83_vm0, %v535_v29, 0.0 }
 0x39d   :  { %544 = vadd.xlane.f32.xlu0 %v543_v30  ;;  %v753_v30 = vld [vmem:[%s1522_s13 + $0x50] sm:$0xff] }
 0x420   :  { %v542_v38 = vpop.xlane.xlu1 %541 }
 0x421   :  { %v550_v39 = vmul.f32 0.03125, %v542_v38  ;;  %v745_v38 = vld [vmem:[%s1522_s13 + $0x10] sm:$0xff] }
 0x422   :  { %v539_v40 = vpop.xlane.xlu0 %538 }
 0x423   :  { %v554_v41 = vadd.f32 1e-05, %v550_v39  ;;  %v549_v42 = vmul.f32 0.03125, %v539_v40  ;;  %v744_v39 = vld [vmem:[%s1522_s13 + $0x8] sm:$0xff]  ;;  %v743_v40 = vld [vmem:[%s1522_s13] sm:$0xff] }
 0x424   :  { %v548_v43 = vpop.xlane.xlu1 %547 }
 0x425   :  { %1067 = vrsqrt.f32 %v554_v41  ;;  %v553_v44 = vadd.f32 1e-05, %v549_v42  ;;  %v552_v45 = vmul.f32 0.03125, %v548_v43  ;;  %vm566_vm9 = vcmp.eq.f32.partialorder %v554_v41, inf }
 0x426   :  { %v545_v46 = vpop.xlane.xlu0 %544  ;;  %v569_v52 = vand.u32 2147483648, %v554_v41  ;;  %vm568_vm10 = vcmp.eq.f32.partialorder %v554_v41, 0.0 }
 0x427   :  { %v551_v47 = vmul.f32 0.03125, %v545_v46  ;;  %1069 = vrsqrt.f32 %v553_v44  ;;  %v556_v48 = vadd.f32 1e-05, %v552_v45  ;;  %vm559_vm11 = vcmp.eq.f32.partialorder %v553_v44, inf }
 0x428   :  { %v562_v57 = vand.u32 2147483648, %v553_v44  ;;  %vm561_vm12 = vcmp.eq.f32.partialorder %v553_v44, 0.0 }
 0x429   :  { %v555_v49 = vadd.f32 1e-05, %v551_v47  ;;  %1071 = vrsqrt.f32 %v556_v48  ;;  %vm580_vm13 = vcmp.eq.f32.partialorder %v556_v48, inf  ;;  %v583_v3 = vand.u32 2147483648, %v556_v48 }
 0x42a   :  { %vm582_vm14 = vcmp.eq.f32.partialorder %v556_v48, 0.0 }
 0x42b   :  { %1073 = vrsqrt.f32 %v555_v49  ;;  %vm573_vm15 = vcmp.eq.f32.partialorder %v555_v49, inf  ;;  %v576_v8 = vand.u32 2147483648, %v555_v49  ;;  %vm575_vm1 = vcmp.eq.f32.partialorder %v555_v49, 0.0 }
 0x432   :  { %v1068_v50 = vpop.eup %1067 }
 0x433   :  { %v565_v51 = vmul.f32 %v1068_v50, %v554_v41 }
 0x434   :  { %v1070_v53 = vpop.eup %1069 }
 0x435   :  { %v567_v54 = vsel %vm566_vm9, %v554_v41, %v565_v51  ;;  %v558_v56 = vmul.f32 %v1070_v53, %v553_v44  ;;  %v894_v41 = vld [vmem:[%s1521_s12] ss:$0 sm:$0xff] }
 0x436   :  { %v570_v55 = vsel %vm568_vm10, %v569_v52, %v567_v54  ;;  %v1072_v58 = vpop.eup %1071 }
 0x437   :  { %1075 = vrcp.f32 %v570_v55  ;;  %v560_v59 = vsel %vm559_vm11, %v553_v44, %v558_v56  ;;  %v579_v63 = vmul.f32 %v1072_v58, %v556_v48 }
 0x438   :  { %v1074_v60 = vpop.eup %1073  ;;  %v563_v61 = vsel %vm561_vm12, %v562_v57, %v560_v59 }
 0x439   :  { %1077 = vrcp.f32 %v563_v61  ;;  %v572_v6 = vmul.f32 %v1074_v60, %v555_v49  ;;  %v581_v7 = vsel %vm580_vm13, %v556_v48, %v579_v63 }
 0x43a   :  { %v584_v10 = vsel %vm582_vm14, %v583_v3, %v581_v7 }
 0x43b   :  { %v574_v2 = vsel %vm573_vm15, %v555_v49, %v572_v6  ;;  %1079 = vrcp.f32 %v584_v10 }
 0x43c   :  { %v577_v0 = vsel %vm575_vm1, %v576_v8, %v574_v2 }
 0x43d   :  { %1081 = vrcp.f32 %v577_v0 }
 0x444   :  { %v1076_v5 = vpop.eup %1075 }
 0x445   :  { %v588_v14 = vmul.f32 %v1076_v5, %v1404_v17  ;;  %v899_v5 = vld [vmem:[%s1523_s14] ss:$0 sm:$0xff]  ;;  %s1131_s14 = scalar_lea.vmem %s865_s29, 512 }
 0x446   :  { %v1078_v16 = vpop.eup %1077  ;;  %p1132_p10 = scmp.ne.s32.totalorder %s865_s29, %s1131_s14  ;;  %p1137_p12 = scmp.lt.s32.totalorder %s1131_s14, %s1131_s14 }
 0x447   :  { %v586_v1 = vmul.f32 %v1078_v16, %v1407_v19  ;;  %v601_v18 = vmul.f32 %v892_v15, %v588_v14 }
 0x448   :  { %v1080_v22 = vpop.eup %1079  ;;  %p1138_p13 = por %p1137_p12, %p1136_p11 }
 0x449   :  { %v600_v12 = vmul.f32 %v892_v15, %v586_v1  ;;  %v592_v13 = vmul.f32 %v1080_v22, %v1412_v24  ;;  %v612_v26 = vadd.f32 %v893_v23, %v601_v18  ;;  %v755_v24 = vld [vmem:[%s1522_s13 + $0x60] sm:$0xff] }
 0x44a   :  { %v1082_v25 = vpop.eup %1081  ;;  %1014 = vmatprep.subr.mxu0 %v755_v24  ;;  %p1139_p0 = pnand %p1138_p13, %p1132_p10 }
 0x44b   :  { %v611_v20 = vadd.f32 %v893_v23, %v600_v12  ;;  %v590_v17 = vmul.f32 %v1082_v25, %v1418_v21  ;;  %v603_v27 = vmul.f32 %v892_v15, %v592_v13  ;;  %1015 = vmatpush3.msra.mxu0 %v755_v24  ;;  %v754_v21 = vld [vmem:[%s1522_s13 + $0x58] sm:$0xff] }
 0x44c   :  { %1016 = vmatprep.subr.mxu0 %v754_v21 }
 0x44d   :  { %1002 = vmatprep.mubr.msk.f32.mxu1 %vm83_vm0, %v611_v20  ;;  %v602_v28 = vmul.f32 %v892_v15, %v590_v17  ;;  %v614_v29 = vadd.f32 %v893_v23, %v603_v27  ;;  %1017 = vmatpush3.msra.mxu0 %v754_v21 }
 0x44e   :  { %1003 = vmatmul.mubr.msk.f32.vlgmr.msra.gmra.mxu1 %vm83_vm0, %v612_v26  ;;  %1018 = vmatprep.subr.mxu0 %v753_v30 }
 0x44f   :  { %v613_v19 = vadd.f32 %v893_v23, %v602_v28  ;;  %1019 = vmatpush3.msra.mxu0 %v753_v30 }
 0x450   :  { %1020 = vmatprep.subr.mxu0 %v752_v31 }
 0x451   :  { %1005 = vmatprep.mubr.msk.f32.mxu1 %vm83_vm0, %v613_v19  ;;  %1021 = vmatpush3.msra.mxu0 %v752_v31 }
 0x452   :  { %1006 = vmatmul.mubr.msk.f32.gmra.mxu1 %vm83_vm0, %v614_v29  ;;  %1022 = vmatprep.subr.mxu0 %v751_v32 }
 0x453   :  { %1023 = vmatpush3.msra.mxu0 %v751_v32 }
 0x454   :  { %1024 = vmatprep.subr.mxu0 %v750_v33 }
 0x455   :  { %1025 = vmatpush3.msra.mxu0 %v750_v33 }
 0x456   :  { %1026 = vmatprep.subr.mxu0 %v749_v34 }
 0x457   :  { %1027 = vmatpush3.msra.mxu0 %v749_v34 }
 0x458   :  { %1028 = vmatprep.subr.mxu0 %v748_v35 }
 0x459   :  { %1029 = vmatpush3.msra.mxu0 %v748_v35 }
 0x45a   :  { %1030 = vmatprep.subr.mxu0 %v747_v36 }
 0x45b   :  { %1031 = vmatpush3.msra.mxu0 %v747_v36 }
 0x45c   :  { %1032 = vmatprep.subr.mxu0 %v746_v37 }
 0x45d   :  { %1033 = vmatpush3.msra.mxu0 %v746_v37 }
 0x45e   :  { %1034 = vmatprep.subr.mxu0 %v745_v38 }
 0x45f   :  { %1035 = vmatpush3.msra.mxu0 %v745_v38 }
 0x460   :  { %1036 = vmatprep.subr.mxu0 %v744_v39 }
 0x461   :  { %1037 = vmatpush3.msra.mxu0 %v744_v39 }
 0x462   :  { %1038 = vmatprep.subr.mxu0 %v743_v40 }
 0x463   :  { %1039 = vmatpush3.msra.mxu0 %v743_v40 }
 0x50e   :  { %v1004_v42 = vpop.f32.mrf.mxu1 }
 0x50f   :  { %v710_v43 = vadd.f32 %v1004_v42, %v894_v41 }
 0x510   :  { %v704_v44 = vpop.f32.mrf.mxu1 }
 0x511   :  { %v728_v45 = vmul.f32 0.70710677, %v710_v43  ;;  %v705_v46 = vadd.f32 %v894_v41, %v704_v44  ;;  %v724_v60 = vmul.f32 0.5, %v710_v43 }
 0x512   :  { %v1007_v47 = vpop.f32.mrf.mxu1 }
 0x513   :  { %1083 = verf.f32 %v728_v45  ;;  %v727_v48 = vmul.f32 0.70710677, %v705_v46  ;;  %v720_v49 = vadd.f32 %v1007_v47, %v894_v41  ;;  %v723_v57 = vmul.f32 0.5, %v705_v46 }
 0x514   :  { %v714_v50 = vpop.f32.mrf.mxu1 }
 0x515   :  { %1085 = verf.f32 %v727_v48  ;;  %v730_v51 = vmul.f32 0.70710677, %v720_v49  ;;  %v715_v52 = vadd.f32 %v894_v41, %v714_v50  ;;  %v726_v10 = vmul.f32 0.5, %v720_v49 }
 0x517   :  { %1087 = verf.f32 %v730_v51  ;;  %v729_v53 = vmul.f32 0.70710677, %v715_v52  ;;  %v725_v7 = vmul.f32 0.5, %v715_v52 }
 0x519   :  { %1089 = verf.f32 %v729_v53 }
 0x520   :  { %v1084_v54 = vpop.eup %1083 }
 0x521   :  { %v736_v56 = vadd.f32 1.0, %v1084_v54 }
 0x522   :  { %v1086_v55 = vpop.eup %1085 }
 0x523   :  { %v735_v58 = vadd.f32 1.0, %v1086_v55  ;;  %v740_v3 = vmul.f32 %v736_v56, %v724_v60 }
 0x524   :  { %v1088_v59 = vpop.eup %1087 }
 0x525   :  { %v739_v61 = vmul.f32 %v735_v58, %v723_v57  ;;  %v738_v6 = vadd.f32 1.0, %v1088_v59 }
 0x526   :  { %v1090_v63 = vpop.eup %1089 }
 0x527   :  { %1040 = vmatprep.mubr.f32.mxu0 %v739_v61  ;;  %v737_v8 = vadd.f32 1.0, %v1090_v63  ;;  %v742_v0 = vmul.f32 %v738_v6, %v726_v10 }
 0x528   :  { %1041 = vmatmul.mubr.f32.vlgmr.msra.gmra.mxu0 %v740_v3 }
 0x529   :  { %v741_v2 = vmul.f32 %v737_v8, %v725_v7 }
 0x52b   :  { %1043 = vmatprep.mubr.f32.mxu0 %v741_v2 }
 0x52c   :  { %1044 = vmatmul.mubr.f32.gmra.mxu0 %v742_v0 }
 0x5e8   :  { %v1042_v14 = vpop.f32.mrf.mxu0 }
 0x5e9   :  { %v838_v15 = vadd.f32 %v1042_v14, %v899_v5 }
 0x5ea   :  { %v832_v16 = vpop.f32.mrf.mxu0 }
 0x5eb   :  { %v852_v1 = vadd.f32 %v838_v15, %v1384_v62  ;;  %v833_v18 = vadd.f32 %v899_v5, %v832_v16 }
 0x5ec   :  { %v1045_v22 = vpop.f32.mrf.mxu0 }
 0x5ed   :  { %856 = vst.msk [vmem:[#allocation7 + $0x8] sm:$0xff] %vm83_vm0, %v852_v1  ;;  %v851_v12 = vadd.f32 %v833_v18, %v1387_v4  ;;  %v848_v23 = vadd.f32 %v1045_v22, %v899_v5 }
 0x5ee   :  { %v842_v25 = vpop.f32.mrf.mxu0 }
 0x5ef   :  { %855 = vst.msk [vmem:[#allocation7] sm:$0xff] %vm83_vm0, %v851_v12  ;;  %v854_v13 = vadd.f32 %v848_v23, %v1392_v9  ;;  %v843_v20 = vadd.f32 %v899_v5, %v842_v25 }
 0x5f1   :  { %858 = vst.msk [vmem:[#allocation7 + $0x18] sm:$0xff] %vm83_vm0, %v854_v13  ;;  %v853_v17 = vadd.f32 %v843_v20, %v1397_v11 }
 0x5f3   :  { %857 = vst.msk [vmem:[#allocation7 + $0x10] sm:$0xff] %vm83_vm0, %v853_v17 }
 0x5f4   :  { %1142 = shalt.err (!%p1139_p0)
}
 0x5f5   :  { %870 = dma.vmem_to_hbm [thread:$0]  %s865_s29, 512, %s1524_s15, [#allocation4], %s1158_s21, %s1158_s21, %s1159_s22  }
 0x5f6   :  { %1155 = dma.done.wait [#allocation4], 512  }
 0x5f7   :  { %1156 = vsyncadd [#allocation4], 4294966784 }
 0x5f8   :  { %874 = vsyncpa [#allocation3], 1 }
 0x5f9   :  { %875 = vsyncpa [#allocation6], 1 }
 0x5fa   :  { %876 = vsyncpa [#allocation4], 1 }

</bundles_post_ra>
